<compile_context>
chip_gen: v5e
topology: v5e:2x2
jax: 0.10.0
libtpu: 0.0.40
codegen_flags: <defaults>
</compile_context>

<pallas_src>
import math

import jax
import jax.numpy as jnp
from jax.experimental import pallas as pl
from jax.experimental.pallas import tpu as pltpu


def _round_up(n, m):
    return ((n + m - 1) // m) * m


# ---------------------------------------------------------------------------
# Small-V path: one fused kernel, no grid, no padding.  out = adj@(relu(adj@w1+b1)@w2)+b2
# ---------------------------------------------------------------------------
def gcn_fused_kernel(adj_ref, w1_ref, b1_ref, w2_ref, b2_ref, out_ref):
    adj = adj_ref[...]
    # layer 1 (x == I  =>  support1 = w1), bias + ReLU, all f32
    h = jnp.maximum(
        jnp.dot(adj, w1_ref[...], preferred_element_type=jnp.float32) + b1_ref[...],
        0.0,
    )
    # layer 2: adj @ (h @ w2) + b2
    s2 = jnp.dot(h, w2_ref[...], preferred_element_type=jnp.float32)
    out_ref[...] = (
        jnp.dot(adj, s2, preferred_element_type=jnp.float32) + b2_ref[...]
    ).astype(out_ref.dtype)


def gcn_forward_fused(adj, w1, b1, w2, b2):
    V = adj.shape[0]
    E = w1.shape[1]
    b1 = b1.reshape(1, E).astype(jnp.float32)
    b2 = b2.reshape(1, E).astype(jnp.float32)
    return pl.pallas_call(
        gcn_fused_kernel,
        out_shape=jax.ShapeDtypeStruct((V, E), jnp.float32),
    )(adj.astype(jnp.float32), w1.astype(jnp.float32), b1,
      w2.astype(jnp.float32), b2)


# ---------------------------------------------------------------------------
# Large-V path: two tiled kernels.
#   layer 1: hw2 = relu(adj @ w1 + b1) @ w2        (h@w2 folded into finalize)
#   layer 2: out = adj @ hw2 + b2
# ---------------------------------------------------------------------------
def gcn_layer1_kernel(adj_ref, w1_ref, b1_ref, w2_ref, hw2_ref, acc_ref):
    k = pl.program_id(1)

    @pl.when(k == 0)
    def _():
        acc_ref[...] = jnp.zeros_like(acc_ref)

    acc_ref[...] += jnp.dot(adj_ref[...], w1_ref[...],
                            preferred_element_type=jnp.float32)

    @pl.when(k == pl.num_programs(1) - 1)
    def _():
        # bias + ReLU in f32 (v5e VPU has no bf16), then fold h @ w2 here so
        # layer 2 never needs the (E_pad, E_pad) weight in VMEM.
        h = jnp.maximum(acc_ref[...] + b1_ref[...], 0.0)
        hw2 = jnp.dot(h.astype(w2_ref.dtype), w2_ref[...],
                      preferred_element_type=jnp.float32)
        hw2_ref[...] = hw2.astype(hw2_ref.dtype)


def gcn_layer2_kernel(adj_ref, hw2_ref, b2_ref, out_ref, acc_ref):
    k = pl.program_id(1)

    @pl.when(k == 0)
    def _():
        acc_ref[...] = jnp.zeros_like(acc_ref)

    acc_ref[...] += jnp.dot(adj_ref[...], hw2_ref[...],
                            preferred_element_type=jnp.float32)

    @pl.when(k == pl.num_programs(1) - 1)
    def _():
        out_ref[...] = (acc_ref[...] + b2_ref[...]).astype(out_ref.dtype)


def gcn_forward_tiled(adj, w1, b1, w2, b2, *, tm=None, tk=None):
    """Tiled path for large V.  adj: (V,V), w1: (V,E), b1: (1,E) or (E,),
    w2: (E,E), b2: (1,E) or (E,).  Returns (V, E) float32."""
    V = adj.shape[0]
    E = w1.shape[1]
    f32, bf16 = jnp.float32, jnp.bfloat16

    # Lane-dense feature axis.
    E_pad = max(128, _round_up(E, 128))

    # Bigger tiles at large V: ~8x fewer grid steps -> closer to HBM roofline.
    if tm is None:
        tm = 512 if V >= 1024 else (256 if V >= 512 else 128)
    if tk is None:
        tk = 1024 if V >= 2048 else (512 if V >= 1024 else (256 if V >= 512 else 128))
    # lcm padding => both tm and tk always divide V_pad exactly (no dropped tails).
    V_pad = _round_up(V, math.lcm(tm, tk))
    # Guarantee >= 2 row tiles so the "parallel" axis can shard across v7x's 2 TCs.
    if V_pad // tm < 2:
        tm_half = V_pad // 2
        if tm_half >= 128 and tm_half % 8 == 0 and V_pad % tm_half == 0:
            tm = tm_half

    # Build padded operands directly in bf16 (no f32 V_pad^2 temporaries).
    # NOTE: adj (and weights) are fixed per graph in the module's __init__, so in
    # real use hoist this padding/cast out of the per-forward path.
    adj_p = jnp.zeros((V_pad, V_pad), bf16).at[:V, :V].set(adj.astype(bf16))
    w1_p = jnp.zeros((V_pad, E_pad), bf16).at[:V, :E].set(w1.astype(bf16))
    w2_p = jnp.zeros((E_pad, E_pad), bf16).at[:E, :E].set(w2.astype(bf16))
    b1_p = jnp.zeros((1, E_pad), f32).at[:, :E].set(b1.reshape(1, E).astype(f32))
    b2_p = jnp.zeros((1, E_pad), f32).at[:, :E].set(b2.reshape(1, E).astype(f32))

    grid = (V_pad // tm, V_pad // tk)
    cparams = pltpu.CompilerParams(
        # row-tile axis shards across TensorCores (v7x megacore); reduction last.
        dimension_semantics=("parallel", "arbitrary"),
        # Headroom for the larger tiles; stays well under v7x's 64 MiB physical.
        vmem_limit_bytes=48 * 1024 * 1024,
    )

    adj_spec = pl.BlockSpec((tm, tk), lambda i, k: (i, k))
    rhs_spec = pl.BlockSpec((tk, E_pad), lambda i, k: (k, 0))
    bias_spec = pl.BlockSpec((1, E_pad), lambda i, k: (0, 0))
    # TODO(synk): at very large E on v7x, single-buffer this resident weight
    # (pipeline_mode=pl.Buffered(1)) to keep it under the 64 MiB VMEM budget.
    w2_spec = pl.BlockSpec((E_pad, E_pad), lambda i, k: (0, 0))
    out_spec = pl.BlockSpec((tm, E_pad), lambda i, k: (i, 0))

    # ---- layer 1: hw2 = relu(adj @ w1 + b1) @ w2 ----
    hw2 = pl.pallas_call(
        gcn_layer1_kernel,
        out_shape=jax.ShapeDtypeStruct((V_pad, E_pad), bf16),
        grid=grid,
        in_specs=[adj_spec, rhs_spec, bias_spec, w2_spec],
        out_specs=out_spec,
        scratch_shapes=[pltpu.VMEM((tm, E_pad), f32)],
        compiler_params=cparams,
    )(adj_p, w1_p, b1_p, w2_p)

    # ---- layer 2: out = adj @ hw2 + b2 ----
    out_p = pl.pallas_call(
        gcn_layer2_kernel,
        out_shape=jax.ShapeDtypeStruct((V_pad, E_pad), f32),
        grid=grid,
        in_specs=[adj_spec, rhs_spec, bias_spec],
        out_specs=out_spec,
        scratch_shapes=[pltpu.VMEM((tm, E_pad), f32)],
        compiler_params=cparams,
    )(adj_p, hw2, b2_p)

    return out_p[:V, :E]


def gcn_forward(adj, w1, b1, w2, b2, *, tm=None, tk=None):
    """GCN forward (eval mode).  Dispatches fused (small) vs tiled (large)."""
    V = adj.shape[0]
    E = w1.shape[1]
    if tm is None and tk is None and V <= 512 and E <= 256:
        return gcn_forward_fused(adj, w1, b1, w2, b2)
    return gcn_forward_tiled(adj, w1, b1, w2, b2, tm=tm, tk=tk)


def row_normalize(mx):
    """Row-normalize matrix (matches GCN.normalize)."""
    rowsum = mx.sum(axis=1)
    r_inv = jnp.where(rowsum == 0.0, 0.0, 1.0 / rowsum)
    return mx * r_inv[:, None]


def _make_inputs(key, V, E):
    k_adj, k_w1, k_b1, k_w2, k_b2 = jax.random.split(key, 5)
    raw = (jax.random.uniform(k_adj, (V, V)) > 0.7).astype(jnp.float32)
    adj = row_normalize(raw + jnp.eye(V, dtype=jnp.float32))
    stdv = 1.0 / math.sqrt(E)
    w1 = jax.random.uniform(k_w1, (V, E), minval=-stdv, maxval=stdv, dtype=jnp.float32)
    b1 = jax.random.uniform(k_b1, (1, E), minval=-stdv, maxval=stdv, dtype=jnp.float32)
    w2 = jax.random.uniform(k_w2, (E, E), minval=-stdv, maxval=stdv, dtype=jnp.float32)
    b2 = jax.random.uniform(k_b2, (1, E), minval=-stdv, maxval=stdv, dtype=jnp.float32)
    return adj, w1, b1, w2, b2


def _reference(adj, w1, b1, w2, b2):
    V = adj.shape[0]
    x = jnp.eye(V, dtype=jnp.float32)
    h = jnp.maximum(adj @ (x @ w1) + b1, 0.0)   # dropout = identity (eval mode)
    return adj @ (h @ w2) + b2


if __name__ == "__main__":
    key = jax.random.PRNGKey(0)
    k_small, k_big = jax.random.split(key)

    # --- module-size check (V=16, E=32): fused single-launch f32 kernel ---
    voc_size, emb_dim = 16, 32
    adj, w1, b1, w2, b2 = _make_inputs(k_small, voc_size, emb_dim)
    out = jax.block_until_ready(gcn_forward(adj, w1, b1, w2, b2))
    ref = _reference(adj, w1, b1, w2, b2)
    assert out.shape == (voc_size, emb_dim)
    assert jnp.allclose(out, ref, atol=5e-3, rtol=5e-3), "fused path mismatch"

    # --- exercise the tiled large-V path at a modest size (bf16 MXU operands) ---
    V2, E2 = 256, 96
    adj2, w1_2, b1_2, w2_2, b2_2 = _make_inputs(k_big, V2, E2)
    out2 = jax.block_until_ready(
        gcn_forward_tiled(adj2, w1_2, b1_2, w2_2, b2_2, tm=128, tk=128))
    ref2 = _reference(adj2, w1_2, b1_2, w2_2, b2_2)
    assert out2.shape == (V2, E2)
    assert jnp.allclose(out2, ref2, atol=3e-2, rtol=3e-2), "tiled path mismatch"

    print("KERNEL_OK")
</pallas_src>

<mosaic_0001>
module attributes {stable_mosaic.version = 11 : i64} {
  func.func @gcn_fused_kernel(%arg0: memref<16x16xf32, #tpu.memory_space<vmem>>, %arg1: memref<16x32xf32, #tpu.memory_space<vmem>>, %arg2: memref<1x32xf32, #tpu.memory_space<vmem>>, %arg3: memref<32x32xf32, #tpu.memory_space<vmem>>, %arg4: memref<1x32xf32, #tpu.memory_space<vmem>>, %arg5: memref<16x32xf32, #tpu.memory_space<vmem>>) attributes {dimension_semantics = [], scalar_prefetch = 0 : i64, scratch_operands = 0 : i64, tpu.core_type = #tpu.core_type<tc>} {
    %c0 = arith.constant 0 : index
    %c0_0 = arith.constant 0 : index
    %0 = vector.load %arg0[%c0, %c0_0] : memref<16x16xf32, #tpu.memory_space<vmem>>, vector<16x16xf32>
    %c0_1 = arith.constant 0 : index
    %c0_2 = arith.constant 0 : index
    %1 = vector.load %arg1[%c0_1, %c0_2] : memref<16x32xf32, #tpu.memory_space<vmem>>, vector<16x32xf32>
    %cst = arith.constant dense<0.000000e+00> : vector<16x32xf32>
    %2 = tpu.matmul %0, %1, %cst {dimension_numbers = #tpu.dot_dimension_numbers<[1], [0], [0], [1], [0, 0, 1, 1], [], []>} : vector<16x16xf32>, vector<16x32xf32>, vector<16x32xf32> -> vector<16x32xf32>
    %c0_3 = arith.constant 0 : index
    %c0_4 = arith.constant 0 : index
    %3 = vector.load %arg2[%c0_3, %c0_4] : memref<1x32xf32, #tpu.memory_space<vmem>>, vector<1x32xf32>
    %4 = vector.broadcast %3 : vector<1x32xf32> to vector<16x32xf32>
    %5 = arith.addf %2, %4 : vector<16x32xf32>
    %cst_5 = arith.constant 0.000000e+00 : f32
    %6 = vector.broadcast %cst_5 : f32 to vector<16x32xf32>
    %7 = arith.maximumf %5, %6 : vector<16x32xf32>
    %c0_6 = arith.constant 0 : index
    %c0_7 = arith.constant 0 : index
    %8 = vector.load %arg3[%c0_6, %c0_7] : memref<32x32xf32, #tpu.memory_space<vmem>>, vector<32x32xf32>
    %cst_8 = arith.constant dense<0.000000e+00> : vector<16x32xf32>
    %9 = tpu.matmul %7, %8, %cst_8 {dimension_numbers = #tpu.dot_dimension_numbers<[1], [0], [0], [1], [0, 0, 1, 1], [], []>} : vector<16x32xf32>, vector<32x32xf32>, vector<16x32xf32> -> vector<16x32xf32>
    %cst_9 = arith.constant dense<0.000000e+00> : vector<16x32xf32>
    %10 = tpu.matmul %0, %9, %cst_9 {dimension_numbers = #tpu.dot_dimension_numbers<[1], [0], [0], [1], [0, 0, 1, 1], [], []>} : vector<16x16xf32>, vector<16x32xf32>, vector<16x32xf32> -> vector<16x32xf32>
    %c0_10 = arith.constant 0 : index
    %c0_11 = arith.constant 0 : index
    %11 = vector.load %arg4[%c0_10, %c0_11] : memref<1x32xf32, #tpu.memory_space<vmem>>, vector<1x32xf32>
    %12 = vector.broadcast %11 : vector<1x32xf32> to vector<16x32xf32>
    %13 = arith.addf %10, %12 : vector<16x32xf32>
    %c0_12 = arith.constant 0 : index
    %c0_13 = arith.constant 0 : index
    %14 = vector.load %arg5[%c0_12, %c0_13] : memref<16x32xf32, #tpu.memory_space<vmem>>, vector<16x32xf32>
    tpu.vector_store %arg5[%c0_12, %c0_13], %13 {strides = array<i32>} : memref<16x32xf32, #tpu.memory_space<vmem>>, vector<16x32xf32>,
    return
  }
}

</mosaic_0001>

<bundles_post_ra>
// kernel: tpu_custom_call.1
= control target key start
LH: loop header
LB: loop body
LE: loop exit
PB: predicated region body
PF: predicated region fallthrough
CT: control target
= control target key end

     0   :  { %10 = vsyncpa [#allocation3], 0  ;;  %s385_s0 = inlined_call_operand.hbm [shape: f32[16,16], index: 0, kind: input, shape index: {}]   ;;  %s386_s1 = inlined_call_operand.hbm [shape: f32[16,32], index: 1, kind: input, shape index: {}]   ;;  %s387_s2 = inlined_call_operand.vmem [shape: f32[1,32], index: 2, kind: input, shape index: {}]   ;;  %s388_s3 = inlined_call_operand.hbm [shape: f32[32,32], index: 3, kind: input, shape index: {}]   ;;  %s389_s4 = inlined_call_operand.vmem [shape: f32[1,32], index: 4, kind: input, shape index: {}]   ;;  %s390_s5 = inlined_call_operand.hbm [shape: f32[16,32], index: 5, kind: output, shape index: {}]  }
   0x1   :  { %11 = vsyncpa [#allocation6], 0 }
   0x2   :  { %12 = vsyncpa [#allocation4], 0  ;;  %s30_s20 = sshll.u32 %s386_s1, 4  ;;  %s311_s21 = smov [#allocation5]   ;;  %s31_s20 = int_to_ptr.hbm [resolvable:$true] %s30_s20 }
   0x3   :  { %s32_s22 = sshll.u32 %s311_s21, 4  ;;  %s17_s25 = sshll.u32 %s385_s0, 4  ;;  %s33_s22 = int_to_ptr.vmem [resolvable:$true] %s32_s22  ;;  %s18_s25 = int_to_ptr.hbm [resolvable:$true] %s17_s25 }
   0x4   :  { %s312_s26 = smov 128   ;;  %s313_s27 = smov 8  }
   0x5   :  { %38 = dma.hbm_to_vmem [thread:$0]  %s31_s20, 256, %s33_s22, [#allocation6], %s312_s26, %s312_s26, %s313_s27  }
   0x6   :  { %s314_s28 = smov [#allocation2]   ;;  %s45_s1 = sshll.u32 %s388_s3, 4  ;;  %s46_s1 = int_to_ptr.hbm [resolvable:$true] %s45_s1 }
   0x7   :  { %s19_s29 = sshll.u32 %s314_s28, 4  ;;  %s315_s0 = smov [#allocation7]   ;;  %s20_s29 = int_to_ptr.vmem [resolvable:$true] %s19_s29 }
   0x8   :  { %25 = dma.hbm_to_vmem [thread:$0]  %s18_s25, 256, %s20_s29, [#allocation3], %s312_s26, %s312_s26, %s313_s27  }
   0x9   :  { %s47_s7 = sshll.u32 %s315_s0, 4  ;;  %s48_s7 = int_to_ptr.vmem [resolvable:$true] %s47_s7 }
   0xa   :  { %53 = dma.hbm_to_vmem [thread:$0]  %s46_s1, 512, %s48_s7, [#allocation6], %s312_s26, %s312_s26, %s313_s27  }
   0xb   :  { %305 = dma.done.wait [#allocation3], 256  }
   0xc   :  { %306 = vsyncadd [#allocation3], 4294967040 }
   0xd   :  { %307 = dma.done.wait [#allocation6], 768  }
   0xe   :  { %308 = vsyncadd [#allocation6], 4294966528  ;;  %v71_v0 = vld [vmem:[#allocation5 + $0x8] sm:$0xff]  ;;  %v70_v1 = vld [vmem:[#allocation5] sm:$0xff]  ;;  %vm76_vm0 = vcmask 130048   ;;  %vm112_vm1 = vcmask 261120  }
   0xf   :  { %97 = vmatpush.msra.mxu0 %v71_v0  ;;  %v68_v2 = vld [vmem:[#allocation2] sm:$0xff]  ;;  %v111_v3 = vld [vmem:[#allocation7 + $0x18] sm:$0xff]  ;;  %v69_v4 = vld [vmem:[#allocation2 + $0x8] sm:$0xff]  ;;  %s316_s10 = smov [#allocation8]   ;;  %s177_s14 = sshll.u32 %s390_s5, 4  ;;  %s178_s14 = int_to_ptr.hbm [resolvable:$true] %s177_s14 }
  0x10   :  { %131 = vmatpush.msra.mxu1 %v111_v3  ;;  %197 = vmatpush.msra.mxu3 %v111_v3  ;;  %v110_v5 = vld [vmem:[#allocation7 + $0x10] sm:$0xff]  ;;  %v109_v6 = vld [vmem:[#allocation7 + $0x8] sm:$0xff]  ;;  %v108_v7 = vld [vmem:[#allocation7] sm:$0xff]  ;;  %s175_s11 = sshll.u32 %s316_s10, 4  ;;  %s176_s11 = int_to_ptr.vmem [resolvable:$true] %s175_s11 }
  0x11   :  { %98 = vmatpush.msra.mxu0 %v70_v1  ;;  %v207_v8 = vld [vmem:[%s387_s2] ss:$0 sm:$0xff] }
  0x12   :  { %191 = vmatmul.msk.f32.vlgmr.msra.gmra.mxu0 %vm76_vm0, %v68_v2  ;;  %132 = vmatpush.msra.mxu1 %v110_v5  ;;  %v208_v17 = vld [vmem:[%s389_s4] ss:$0 sm:$0xff] }
  0x13   :  { %198 = vmatpush.msra.mxu3 %v110_v5 }
  0x14   :  { %133 = vmatpush.msra.mxu1 %v109_v6 }
  0x15   :  { %199 = vmatpush.msra.mxu3 %v109_v6 }
  0x16   :  { %134 = vmatpush.msra.mxu1 %v108_v7 }
  0x17   :  { %200 = vmatpush.msra.mxu3 %v108_v7 }
  0x1a   :  { %192 = vmatmul.msk.f32.gmra.mxu0 %vm76_vm0, %v69_v4 }
  0x8f   :  { %v100_v9 = vpop.f32.mrf.mxu0 }
  0x90   :  { %v101_v10 = vadd.f32 %v207_v8, %v100_v9 }
  0x92   :  { %v106_v11 = vmax.f32 %v101_v10, 0.0 }
  0x94   :  { %193 = vmatmul.msk.f32.vlgmr.msra.gmra.mxu1 %vm112_vm1, %v106_v11 }
  0x97   :  { %v103_v12 = vpop.f32.mrf.mxu0 }
  0x98   :  { %v104_v13 = vadd.f32 %v207_v8, %v103_v12 }
  0x9a   :  { %v107_v14 = vmax.f32 %v104_v13, 0.0 }
  0x9c   :  { %194 = vmatmul.msk.f32.vlgmr.msra.gmra.mxu3 %vm112_vm1, %v107_v14 }
 0x111   :  { %v136_v16 = vpop.f32.mrf.mxu1 }
 0x11f   :  { %v139_v15 = vpop.f32.mrf.mxu3 }
 0x120   :  { %160 = vmatpush.msra.mxu2 %v139_v15 }
 0x122   :  { %161 = vmatpush.msra.mxu2 %v136_v16 }
 0x123   :  { %195 = vmatmul.msk.f32.vlgmr.msra.gmra.mxu2 %vm76_vm0, %v68_v2 }
 0x12b   :  { %196 = vmatmul.msk.f32.gmra.mxu2 %vm76_vm0, %v69_v4 }
 0x1a6   :  { %v163_v18 = vpop.f32.mrf.mxu2 }
 0x1a7   :  { %v164_v19 = vadd.f32 %v208_v17, %v163_v18 }
 0x1a9   :  { %169 = vst.msk [vmem:[#allocation8] sm:$0xff] %vm112_vm1, %v164_v19 }
 0x1ae   :  { %v166_v20 = vpop.f32.mrf.mxu2 }
 0x1af   :  { %v167_v21 = vadd.f32 %v208_v17, %v166_v20 }
 0x1b1   :  { %170 = vst.msk [vmem:[#allocation8 + $0x8] sm:$0xff] %vm112_vm1, %v167_v21 }
 0x1b2   :  { %183 = dma.vmem_to_hbm [thread:$0]  %s176_s11, 256, %s178_s14, [#allocation4], %s312_s26, %s312_s26, %s313_s27  }
 0x1b3   :  { %309 = dma.done.wait [#allocation4], 256  }
 0x1b4   :  { %310 = vsyncadd [#allocation4], 4294967040 }
 0x1b5   :  { %188 = vsyncpa [#allocation3], 1 }
 0x1b6   :  { %189 = vsyncpa [#allocation6], 1 }
 0x1b7   :  { %190 = vsyncpa [#allocation4], 1 }

</bundles_post_ra>
